<compile_context>
chip_gen: v7x
topology: tpu7x:2x2x1
jax: 0.10.0
libtpu: 0.0.40
codegen_flags: <defaults>
</compile_context>

<pallas_src>
import numpy as np
import jax
import jax.numpy as jnp
from jax.experimental import pallas as pl
from jax.experimental.pallas import tpu as pltpu

_VMEM_LIMIT_BYTES = 32 * 1024 * 1024     # safe on v5e/v6e (128 MiB) and v7x (64 MiB)
_MAX_TILE_ROWS = 2048                    # upper bound on packed rows per grid step


def _make_offset_scale_kernel(num_heads):
    def kernel(x_ref, gamma_ref, beta_ref, *out_refs):
        # x_ref:     (tn, Dp) tile of (packed) rows
        # gamma_ref: (H, Dp)  resident params (constant index_map -> fetched once)
        # beta_ref:  (H, Dp)
        # out_refs:  H output refs, each (tn, Dp)
        x = x_ref[...]
        g = gamma_ref[...]
        b = beta_ref[...]
        for h in range(num_heads):                    # static unroll over heads
            out_refs[h][...] = x * g[h:h + 1, :] + b[h:h + 1, :]
    return kernel


def _select_tile_rows(rows, sub, max_tn):
    """Pick the tile row count for the 1-D streaming grid.

    Preference order:
      1. a sublane-aligned tile that divides `rows` exactly and gives >= 2 grid
         steps (pipelining / megacore) with zero wrapper padding,
      2. a single full-extent tile (no padding),
      3. the largest sublane-aligned tile <= max_tn (wrapper pads -- rare fallback).
    Returns (tn, needs_padding).
    """
    max_tn = max(sub, (max_tn // sub) * sub)
    if rows <= max_tn:
        if rows >= 2 * sub and rows % sub == 0:
            half = rows // 2
            t = (half // sub) * sub
            while t >= sub:
                if rows % t == 0:
                    return t, False          # grid >= 2, no padding
                t -= sub
        return rows, False                   # single full-extent tile
    # rows > max_tn: need multiple tiles -- look for an exact divisor first.
    t = max_tn
    while t >= sub:
        if rows % t == 0:
            return t, False
        t -= sub
    return max_tn, True                      # fallback: wrapper pads rows


def offset_scale(x, gamma, beta, *, tn=None):
    """Pallas implementation of OffsetScale.forward.

    x:     (..., D)
    gamma: (H, D)
    beta:  (H, D)
    returns: tuple of H arrays, each of shape (..., D)   (== torch out.unbind(dim=-2))
    """
    orig_shape = x.shape
    D = int(orig_shape[-1])
    H = int(gamma.shape[0])
    lead = orig_shape[:-1]
    N = int(np.prod(lead)) if lead else 1

    # Common compute dtype (matches elementwise promotion of x*gamma + beta).
    out_dtype = jnp.result_type(x.dtype, gamma.dtype, beta.dtype)
    x = x.astype(out_dtype)
    gamma = gamma.astype(out_dtype)
    beta = beta.astype(out_dtype)
    dsize = jnp.dtype(out_dtype).itemsize
    sub = max(8, 32 // dsize)                # sublane alignment: 8 f32 / 16 bf16 / 32 int8

    x2 = x.reshape(N, D)

    # ---- lane-dense repack for small D ------------------------------------------------
    if D < 128 and 128 % D == 0:
        f = 128 // D
    else:
        f = 1
    Dp = D * f
    pad_tok = (-N) % f
    if pad_tok:
        x2 = jnp.concatenate([x2, jnp.zeros((pad_tok, D), x2.dtype)], axis=0)
    rows = (N + pad_tok) // f
    xp = x2.reshape(rows, Dp)
    gammap = jnp.tile(gamma, (1, f)) if f > 1 else gamma   # (H, Dp)
    betap = jnp.tile(beta, (1, f)) if f > 1 else beta      # (H, Dp)

    # ---- VMEM-budget-derived tile size -------------------------------------------------
    budget = _VMEM_LIMIT_BYTES // 2                        # headroom for params/metadata
    bytes_per_row = max(1, (1 + H) * Dp * dsize * 2)       # double-buffered in + H outs
    budget_tn = max(sub, budget // bytes_per_row)
    max_tn = min(_MAX_TILE_ROWS, budget_tn)

    if tn is None:
        tn, _ = _select_tile_rows(rows, sub, max_tn)
    else:
        tn = int(tn)
        if tn >= rows:
            tn = rows                                      # single full-extent tile
        else:
            tn = max(sub, (tn // sub) * sub)               # keep blocks sublane-aligned

    tn = max(1, tn)
    pad_rows = (-rows) % tn
    if pad_rows:
        xp = jnp.concatenate([xp, jnp.zeros((pad_rows, Dp), xp.dtype)], axis=0)
    rows_p = rows + pad_rows
    grid = rows_p // tn

    # ---- pallas_call -------------------------------------------------------------------
    kernel = _make_offset_scale_kernel(H)
    cost = pl.CostEstimate(
        flops=2 * H * rows_p * Dp,
        transcendentals=0,
        bytes_accessed=(rows_p * Dp + 2 * H * Dp + H * rows_p * Dp) * dsize,
    )

    outs = pl.pallas_call(
        kernel,
        out_shape=tuple(
            jax.ShapeDtypeStruct((rows_p, Dp), out_dtype) for _ in range(H)
        ),
        grid_spec=pltpu.PrefetchScalarGridSpec(
            num_scalar_prefetch=0,
            grid=(grid,),
            in_specs=[
                pl.BlockSpec((tn, Dp), lambda i: (i, 0)),
                pl.BlockSpec((H, Dp), lambda i: (0, 0)),   # params stay resident
                pl.BlockSpec((H, Dp), lambda i: (0, 0)),
            ],
            out_specs=tuple(
                pl.BlockSpec((tn, Dp), lambda i: (i, 0)) for _ in range(H)
            ),
        ),
        compiler_params=pltpu.CompilerParams(
            dimension_semantics=("parallel",),
            vmem_limit_bytes=_VMEM_LIMIT_BYTES,
        ),
        cost_estimate=cost,
    )(xp, gammap, betap)

    # ---- unpack back to (..., D) per head ----------------------------------------------
    results = []
    for h in range(H):
        o = outs[h]
        if pad_rows:
            o = o[:rows]
        o = o.reshape(rows * f, D)
        if pad_tok:
            o = o[:N]
        results.append(o.reshape(lead + (D,)))
    return tuple(results)


if __name__ == "__main__":
    key = jax.random.PRNGKey(0)
    k_x, k_g, k_x2, k_x3, k_x4 = jax.random.split(key, 5)

    def ref_offset_scale(x, gamma, beta):
        out = x[..., None, :] * gamma + beta          # (..., H, D)
        return tuple(out[..., h, :] for h in range(gamma.shape[0]))

    # Case 1: shapes consistent with the module (batch=2, seq=8, dim=32, heads=2).
    B, S, D, H = 2, 8, 32, 2
    x = jax.random.normal(k_x, (B, S, D), dtype=jnp.float32)
    gamma = 0.02 * jax.random.normal(k_g, (H, D), dtype=jnp.float32)  # init.normal_(std=0.02)
    beta = jnp.zeros((H, D), dtype=jnp.float32)

    outs = jax.block_until_ready(offset_scale(x, gamma, beta))
    refs = ref_offset_scale(x, gamma, beta)
    for h in range(H):
        assert outs[h].shape == (B, S, D)
        assert jnp.allclose(outs[h], refs[h], atol=1e-6, rtol=1e-6)

    # Case 2: multi-step pipelined grid (rows > tile) with lane-dense repack.
    x2 = jax.random.normal(k_x2, (4, 64, D), dtype=jnp.float32)
    outs2 = jax.block_until_ready(offset_scale(x2, gamma, beta))
    refs2 = ref_offset_scale(x2, gamma, beta)
    for h in range(H):
        assert jnp.allclose(outs2[h], refs2[h], atol=1e-6, rtol=1e-6)

    # Case 3: D that does not divide 128 and a ragged row count
    # (now handled with a single full-extent tile -> no wrapper padding copies).
    D3 = 48
    x3 = jax.random.normal(k_x3, (2, 10, D3), dtype=jnp.float32)
    g3 = 0.02 * jax.random.normal(k_g, (H, D3), dtype=jnp.float32)
    b3 = 0.1 * jnp.ones((H, D3), dtype=jnp.float32)
    outs3 = jax.block_until_ready(offset_scale(x3, g3, b3))
    refs3 = ref_offset_scale(x3, g3, b3)
    for h in range(H):
        assert jnp.allclose(outs3[h], refs3[h], atol=1e-6, rtol=1e-6)

    # Case 4: bf16 path (16-sublane alignment) with a multi-step grid.
    x4 = jax.random.normal(k_x4, (4, 64, D), dtype=jnp.bfloat16)
    g4 = gamma.astype(jnp.bfloat16)
    b4 = (0.05 * jnp.ones((H, D))).astype(jnp.bfloat16)
    outs4 = jax.block_until_ready(offset_scale(x4, g4, b4))
    refs4 = ref_offset_scale(x4.astype(jnp.float32),
                             g4.astype(jnp.float32), b4.astype(jnp.float32))
    for h in range(H):
        assert jnp.allclose(outs4[h].astype(jnp.float32), refs4[h], atol=2e-2, rtol=2e-2)

    print("KERNEL_OK")
</pallas_src>

<mosaic_0001>
module attributes {stable_mosaic.version = 11 : i64} {
  func.func @kernel(%arg0: i32, %arg1: memref<4x128xf32, #tpu.memory_space<vmem>>, %arg2: memref<2x128xf32, #tpu.memory_space<vmem>>, %arg3: memref<2x128xf32, #tpu.memory_space<vmem>>, %arg4: memref<4x128xf32, #tpu.memory_space<vmem>>, %arg5: memref<4x128xf32, #tpu.memory_space<vmem>>) attributes {dimension_semantics = [#tpu.dimension_semantics<parallel>], iteration_bounds = array<i64: 1>, scalar_prefetch = 0 : i64, scratch_operands = 0 : i64, tpu.core_type = #tpu.core_type<tc>, window_params = [{transform_indices = @transform_0, window_bounds = array<i64: 4, 128>}, {pipeline_mode = #tpu.pipeline_mode<synchronous>, transform_indices = @transform_1, window_bounds = array<i64: 2, 128>}, {pipeline_mode = #tpu.pipeline_mode<synchronous>, transform_indices = @transform_2, window_bounds = array<i64: 2, 128>}, {transform_indices = @transform_3, window_bounds = array<i64: 4, 128>}, {transform_indices = @transform_4, window_bounds = array<i64: 4, 128>}]} {
    %c0 = arith.constant 0 : index
    %c0_0 = arith.constant 0 : index
    %0 = vector.load %arg1[%c0, %c0_0] : memref<4x128xf32, #tpu.memory_space<vmem>>, vector<4x128xf32>
    %c0_1 = arith.constant 0 : index
    %c0_2 = arith.constant 0 : index
    %1 = vector.load %arg2[%c0_1, %c0_2] : memref<2x128xf32, #tpu.memory_space<vmem>>, vector<2x128xf32>
    %c0_3 = arith.constant 0 : index
    %c0_4 = arith.constant 0 : index
    %2 = vector.load %arg3[%c0_3, %c0_4] : memref<2x128xf32, #tpu.memory_space<vmem>>, vector<2x128xf32>
    %3 = vector.extract_strided_slice %1 {offsets = [0, 0], sizes = [1, 128], strides = [1, 1]} : vector<2x128xf32> to vector<1x128xf32>
    %4 = vector.broadcast %3 : vector<1x128xf32> to vector<4x128xf32>
    %5 = arith.mulf %0, %4 : vector<4x128xf32>
    %6 = vector.extract_strided_slice %2 {offsets = [0, 0], sizes = [1, 128], strides = [1, 1]} : vector<2x128xf32> to vector<1x128xf32>
    %7 = vector.broadcast %6 : vector<1x128xf32> to vector<4x128xf32>
    %8 = arith.addf %5, %7 : vector<4x128xf32>
    %c0_5 = arith.constant 0 : index
    %c0_6 = arith.constant 0 : index
    %9 = vector.load %arg4[%c0_5, %c0_6] : memref<4x128xf32, #tpu.memory_space<vmem>>, vector<4x128xf32>
    tpu.vector_store %arg4[%c0_5, %c0_6], %8 {strides = array<i32>} : memref<4x128xf32, #tpu.memory_space<vmem>>, vector<4x128xf32>,
    %10 = vector.extract_strided_slice %1 {offsets = [1, 0], sizes = [1, 128], strides = [1, 1]} : vector<2x128xf32> to vector<1x128xf32>
    %11 = vector.broadcast %10 : vector<1x128xf32> to vector<4x128xf32>
    %12 = arith.mulf %0, %11 : vector<4x128xf32>
    %13 = vector.extract_strided_slice %2 {offsets = [1, 0], sizes = [1, 128], strides = [1, 1]} : vector<2x128xf32> to vector<1x128xf32>
    %14 = vector.broadcast %13 : vector<1x128xf32> to vector<4x128xf32>
    %15 = arith.addf %12, %14 : vector<4x128xf32>
    %c0_7 = arith.constant 0 : index
    %c0_8 = arith.constant 0 : index
    %16 = vector.load %arg5[%c0_7, %c0_8] : memref<4x128xf32, #tpu.memory_space<vmem>>, vector<4x128xf32>
    tpu.vector_store %arg5[%c0_7, %c0_8], %15 {strides = array<i32>} : memref<4x128xf32, #tpu.memory_space<vmem>>, vector<4x128xf32>,
    return
  }
  func.func @transform_0(%arg0: i32) -> (i32, i32) {
    %c0_i32 = arith.constant 0 : i32
    %c0_i32_0 = arith.constant 0 : i32
    return %arg0, %c0_i32 : i32, i32
  }
  func.func @transform_1(%arg0: i32) -> (i32, i32) {
    %c0_i32 = arith.constant 0 : i32
    %c0_i32_0 = arith.constant 0 : i32
    %c0_i32_1 = arith.constant 0 : i32
    return %c0_i32, %c0_i32_0 : i32, i32
  }
  func.func @transform_2(%arg0: i32) -> (i32, i32) {
    %c0_i32 = arith.constant 0 : i32
    %c0_i32_0 = arith.constant 0 : i32
    %c0_i32_1 = arith.constant 0 : i32
    return %c0_i32, %c0_i32_0 : i32, i32
  }
  func.func @transform_3(%arg0: i32) -> (i32, i32) {
    %c0_i32 = arith.constant 0 : i32
    %c0_i32_0 = arith.constant 0 : i32
    return %arg0, %c0_i32 : i32, i32
  }
  func.func @transform_4(%arg0: i32) -> (i32, i32) {
    %c0_i32 = arith.constant 0 : i32
    %c0_i32_0 = arith.constant 0 : i32
    return %arg0, %c0_i32 : i32, i32
  }
}

</mosaic_0001>

<bundles_post_ra>
// kernel: tpu_custom_call.1
= control target key start
LH: loop header
LB: loop body
LE: loop exit
PB: predicated region body
PF: predicated region fallthrough
CT: control target
= control target key end

     0   :  { %10 = vsyncpa [#allocation3], 0  ;;  %s229_s0 = inlined_call_operand.hbm [shape: f32[4,128], index: 0, kind: input, shape index: {}]   ;;  %s230_s1 = inlined_call_operand.vmem [shape: f32[2,128], index: 1, kind: input, shape index: {}]   ;;  %s231_s2 = inlined_call_operand.vmem [shape: f32[2,128], index: 2, kind: input, shape index: {}]   ;;  %s232_s3 = inlined_call_operand.hbm [shape: f32[4,128], index: 3, kind: output, shape index: {0}]   ;;  %s233_s4 = inlined_call_operand.hbm [shape: f32[4,128], index: 4, kind: output, shape index: {1}]  }
   0x1   :  { %11 = vsyncpa [#allocation4], 0 }
   0x2   :  { %12 = vsyncpa [#allocation7], 0  ;;  %s159_s15 = smov [#allocation2]   ;;  %s87_s19 = scalar_lea.hbm %s229_s0, 64 }
   0x3   :  { %s19_s16 = sshll.u32 %s159_s15, 4  ;;  %p88_p0 = scmp.ne.s32.totalorder %s229_s0, %s87_s19  ;;  %s20_s16 = int_to_ptr.vmem [resolvable:$true] %s19_s16 }
   0x4   :  { %p91_p1 = scmp.lt.u32.totalorder %s87_s19, %s229_s0 }
   0x6   :  { %p93_p2 = pnand %p91_p1, %p88_p0 }
   0x8   :  { %96 = shalt.err (!%p93_p2)
}
   0x9   :  { %s97_s24 = scalar_lea.vmem %s20_s16, 64  ;;  %p102_p4 = scmp.lt.s32.totalorder %s20_s16, %s20_s16 }
   0xa   :  { %p98_p3 = scmp.ne.s32.totalorder %s20_s16, %s97_s24  ;;  %p103_p5 = scmp.lt.s32.totalorder %s97_s24, %s97_s24 }
   0xc   :  { %p104_p6 = por %p103_p5, %p102_p4 }
   0xe   :  { %p105_p7 = pnand %p104_p6, %p98_p3 }
  0x10   :  { %108 = shalt.err (!%p105_p7)
}
  0x11   :  { %22 = dma.hbm_to_vmem [thread:$0]  %s229_s0, 64, %s20_s16, [#allocation3]  }
  0x12   :  { %153 = dma.done.wait [#allocation3], 64  }
  0x13   :  { %154 = vsyncadd [#allocation3], 4294967232  ;;  %v33_v0 = vlaneseq  ;;  %v30_v4 = vld [vmem:[#allocation2] sm:$0xf]  ;;  %s160_s0 = smov [#allocation5]   ;;  %s161_s6 = smov [#allocation6]  }
  0x14   :  { %v31_v5 = vld [vmem:[%s230_s1] sm:$0x3]  ;;  %s61_s5 = sshll.u32 %s160_s0, 4  ;;  %s71_s7 = sshll.u32 %s161_s6, 4  ;;  %s62_s5 = int_to_ptr.vmem [resolvable:$true] %s61_s5  ;;  %s72_s7 = int_to_ptr.vmem [resolvable:$true] %s71_s7 }
  0x15   :  { %v34_v1 = vshrl.u32 %v33_v0, 7  ;;  %v32_v6 = vld [vmem:[%s231_s2] sm:$0x3]  ;;  %s109_s1 = scalar_lea.vmem %s62_s5, 64  ;;  %p114_p9 = scmp.lt.s32.totalorder %s62_s5, %s62_s5 }
  0x16   :  { %p110_p8 = scmp.ne.s32.totalorder %s62_s5, %s109_s1  ;;  %p115_p10 = scmp.lt.s32.totalorder %s109_s1, %s109_s1 }
  0x17   :  { %v35_v2 = vsub.s32 0, %v34_v1  ;;  %v46_v3 = vsub.s32 1, %v34_v1 }
  0x18   :  { %p116_p11 = por %p115_p10, %p114_p9 }
  0x19   :  { %v36_v7 = vrot.slane %v31_v5, %v35_v2  ;;  %v41_v8 = vrot.slane %v32_v6, %v35_v2  ;;  %v47_v9 = vrot.slane %v31_v5, %v46_v3  ;;  %v52_v10 = vrot.slane %v32_v6, %v46_v3 }
  0x1a   :  { %p117_p12 = pnand %p116_p11, %p110_p8 }
  0x1b   :  { %v37_v11 = vmul.f32 %v36_v7, %v30_v4  ;;  %v48_v12 = vmul.f32 %v47_v9, %v30_v4 }
  0x1d   :  { %v42_v13 = vadd.f32 %v41_v8, %v37_v11  ;;  %v53_v14 = vadd.f32 %v52_v10, %v48_v12 }
  0x1f   :  { %43 = vst [vmem:[#allocation5] sm:$0xf] %v42_v13  ;;  %54 = vst [vmem:[#allocation6] sm:$0xf] %v53_v14 }
  0x20   :  { %120 = shalt.err (!%p117_p12)
}
  0x21   :  { %s121_s9 = scalar_lea.hbm %s232_s3, 64 }
  0x22   :  { %p122_p13 = scmp.ne.s32.totalorder %s232_s3, %s121_s9  ;;  %p125_p0 = scmp.lt.u32.totalorder %s121_s9, %s232_s3 }
  0x24   :  { %p127_p1 = pnand %p125_p0, %p122_p13 }
  0x26   :  { %130 = shalt.err (!%p127_p1)
}
  0x27   :  { %64 = dma.vmem_to_hbm [thread:$0]  %s62_s5, 64, %s232_s3, [#allocation4]  }
  0x28   :  { %s131_s16 = scalar_lea.vmem %s72_s7, 64  ;;  %p136_p3 = scmp.lt.s32.totalorder %s72_s7, %s72_s7 }
  0x29   :  { %p132_p2 = scmp.ne.s32.totalorder %s72_s7, %s131_s16  ;;  %p137_p4 = scmp.lt.s32.totalorder %s131_s16, %s131_s16 }
  0x2b   :  { %p138_p5 = por %p137_p4, %p136_p3 }
  0x2d   :  { %p139_p6 = pnand %p138_p5, %p132_p2 }
  0x2f   :  { %142 = shalt.err (!%p139_p6)
}
  0x30   :  { %s143_s19 = scalar_lea.hbm %s233_s4, 64 }
  0x31   :  { %p144_p7 = scmp.ne.s32.totalorder %s233_s4, %s143_s19  ;;  %p147_p8 = scmp.lt.u32.totalorder %s143_s19, %s233_s4 }
  0x33   :  { %p149_p9 = pnand %p147_p8, %p144_p7 }
  0x35   :  { %152 = shalt.err (!%p149_p9)
}
  0x36   :  { %74 = dma.vmem_to_hbm [thread:$0]  %s72_s7, 64, %s233_s4, [#allocation7]  }
  0x37   :  { %155 = dma.done.wait [#allocation4], 64  }
  0x38   :  { %156 = vsyncadd [#allocation4], 4294967232 }
  0x39   :  { %157 = dma.done.wait [#allocation7], 64  }
  0x3a   :  { %158 = vsyncadd [#allocation7], 4294967232 }
  0x3b   :  { %81 = vsyncpa [#allocation3], 1 }
  0x3c   :  { %82 = vsyncpa [#allocation4], 1 }
  0x3d   :  { %83 = vsyncpa [#allocation7], 1 }

</bundles_post_ra>
